<compile_context>
chip_gen: v7x
topology: tpu7x:2x2x1
jax: 0.10.0
libtpu: 0.0.40
codegen_flags: <defaults>
</compile_context>

<pallas_src>
import functools

import jax
import jax.numpy as jnp
from jax.experimental import pallas as pl
from jax.experimental.pallas import tpu as pltpu

_LANE = 128
_SUBLANE = 8


def _round_up(n, m):
    return ((n + m - 1) // m) * m


def _pick_block_b(B):
    """8-aligned batch tile; guarantees >=2 grid steps when the batch allows it."""
    Bp8 = _round_up(B, _SUBLANE)
    if Bp8 <= _SUBLANE:
        return _SUBLANE
    blk = min(256, Bp8)
    if blk == Bp8:
        # Single-step grid would mean zero pipelining and an idle second TC on v7x.
        blk = _round_up(Bp8 // 2, _SUBLANE)
    return blk


def _qnet_kernel(x_ref,
                 w1_ref, b1_ref,
                 w2_ref, b2_ref,
                 w3_ref, b3_ref,
                 w4_ref, b4_ref,
                 o_ref):
    # x tile and weights are bf16; MXU matmuls accumulate in f32.
    # Bias-add + ReLU epilogue stays in f32 (friendly to v5e's f32-only VPU).
    x = x_ref[...]

    h = jnp.dot(x, w1_ref[...], preferred_element_type=jnp.float32) + b1_ref[...]
    h = jnp.maximum(h, 0.0).astype(jnp.bfloat16)

    h = jnp.dot(h, w2_ref[...], preferred_element_type=jnp.float32) + b2_ref[...]
    h = jnp.maximum(h, 0.0).astype(jnp.bfloat16)

    h = jnp.dot(h, w3_ref[...], preferred_element_type=jnp.float32) + b3_ref[...]
    h = jnp.maximum(h, 0.0).astype(jnp.bfloat16)

    out = jnp.dot(h, w4_ref[...], preferred_element_type=jnp.float32) + b4_ref[...]
    o_ref[...] = out.astype(o_ref.dtype)


@functools.partial(jax.jit, static_argnames=("block_b",))
def qnetwork_forward(x, params, *, block_b=None):
    """Fused 4-layer MLP forward pass in a single Pallas kernel.

    x:      (B, input_dims) float32
    params: dict with w1..w4 of shape (in, out) and b1..b4 of shape (1, out) (f32).
    """
    w1, b1 = params["w1"], params["b1"]
    w2, b2 = params["w2"], params["b2"]
    w3, b3 = params["w3"], params["b3"]
    w4, b4 = params["w4"], params["b4"]

    B, D_in = x.shape
    H = w1.shape[1]
    A = w4.shape[1]

    if block_b is None:
        block_b = _pick_block_b(B)
    if block_b % _SUBLANE != 0:
        raise ValueError("block_b must be a multiple of 8 (TPU sublane constraint)")

    # Lane-dense (128-multiple) feature dims; 8-aligned, block_b-divisible batch.
    Dp = _round_up(D_in, _LANE)
    Hp = _round_up(H, _LANE)
    Ap = _round_up(A, _LANE)
    Bp = _round_up(B, block_b)

    def pad2(a, rows, cols):
        return jnp.pad(a, ((0, rows - a.shape[0]), (0, cols - a.shape[1])))

    xp = pad2(x, Bp, Dp).astype(jnp.bfloat16)
    w1p = pad2(w1, Dp, Hp).astype(jnp.bfloat16)
    w2p = pad2(w2, Hp, Hp).astype(jnp.bfloat16)
    w3p = pad2(w3, Hp, Hp).astype(jnp.bfloat16)
    w4p = pad2(w4, Hp, Ap).astype(jnp.bfloat16)
    b1p = pad2(b1, 1, Hp).astype(jnp.float32)
    b2p = pad2(b2, 1, Hp).astype(jnp.float32)
    b3p = pad2(b3, 1, Hp).astype(jnp.float32)
    b4p = pad2(b4, 1, Ap).astype(jnp.float32)

    grid = (Bp // block_b,)

    def act_map(i):
        return (i, 0)

    def bcast_map(i):
        return (0, 0)   # weights/biases: fetched once, stay resident across the grid

    in_specs = [
        pl.BlockSpec((block_b, Dp), act_map),                                  # x
        pl.BlockSpec((Dp, Hp), bcast_map), pl.BlockSpec((1, Hp), bcast_map),   # fc1
        pl.BlockSpec((Hp, Hp), bcast_map), pl.BlockSpec((1, Hp), bcast_map),   # fc2
        pl.BlockSpec((Hp, Hp), bcast_map), pl.BlockSpec((1, Hp), bcast_map),   # fc3
        pl.BlockSpec((Hp, Ap), bcast_map), pl.BlockSpec((1, Ap), bcast_map),   # fc4
    ]
    out_spec = pl.BlockSpec((block_b, Ap), act_map)

    # Explicit VMEM budget: double-buffered x/out tiles + resident weights/biases,
    # with headroom; clamped so a config that fits v6e also fits v7x's 64 MiB.
    w_bytes = (Dp * Hp + 2 * Hp * Hp + Hp * Ap) * 2        # bf16 weights
    bias_bytes = (3 * Hp + Ap) * 4                         # f32 biases
    x_tile = block_b * Dp * 2                              # bf16 activations
    o_tile = block_b * Ap * 4                              # f32 outputs
    vmem_bytes = 2 * (x_tile + o_tile) + 2 * (w_bytes + bias_bytes)
    vmem_limit = min(max(int(vmem_bytes * 1.25) + (1 << 20), 16 << 20), 64 << 20)

    flops = 2 * Bp * (Dp * Hp + 2 * Hp * Hp + Hp * Ap)
    bytes_accessed = Bp * Dp * 2 + w_bytes + bias_bytes + Bp * Ap * 4
    cost = pl.CostEstimate(flops=flops, transcendentals=0,
                           bytes_accessed=bytes_accessed)

    out_padded = pl.pallas_call(
        _qnet_kernel,
        out_shape=jax.ShapeDtypeStruct((Bp, Ap), jnp.float32),
        grid_spec=pltpu.PrefetchScalarGridSpec(
            num_scalar_prefetch=0,
            grid=grid,
            in_specs=in_specs,
            out_specs=out_spec,
        ),
        compiler_params=pltpu.CompilerParams(
            dimension_semantics=("parallel",),
            vmem_limit_bytes=vmem_limit,
        ),
        cost_estimate=cost,
    )(xp, w1p, b1p, w2p, b2p, w3p, b3p, w4p, b4p)

    # Slice off batch/feature padding outside the kernel (lane-dense store inside).
    return out_padded[:B, :A]


def init_qnetwork_params(key, input_dims, n_actions, hidden_nodes):
    """Deterministic init mimicking PyTorch nn.Linear default:
    U(-1/sqrt(fan_in), 1/sqrt(fan_in)) for both weight and bias."""
    dims = [(input_dims, hidden_nodes),
            (hidden_nodes, hidden_nodes),
            (hidden_nodes, hidden_nodes),
            (hidden_nodes, n_actions)]
    params = {}
    keys = jax.random.split(key, 2 * len(dims))
    for idx, (fan_in, fan_out) in enumerate(dims):
        bound = 1.0 / jnp.sqrt(jnp.float32(fan_in))
        wk, bk = keys[2 * idx], keys[2 * idx + 1]
        # stored as (in, out) so the kernel does x @ W
        params[f"w{idx+1}"] = jax.random.uniform(
            wk, (fan_in, fan_out), jnp.float32, minval=-bound, maxval=bound)
        params[f"b{idx+1}"] = jax.random.uniform(
            bk, (1, fan_out), jnp.float32, minval=-bound, maxval=bound)
    return params


def qnetwork_forward_ref(x, params):
    """Pure-JAX f32 reference (same math as the PyTorch module)."""
    h = jax.nn.relu(x @ params["w1"] + params["b1"])
    h = jax.nn.relu(h @ params["w2"] + params["b2"])
    h = jax.nn.relu(h @ params["w3"] + params["b3"])
    return h @ params["w4"] + params["b4"]


def qnetwork_forward_ref_mixed(x, params):
    """Pure-JAX mirror of the kernel's mixed precision: bf16 matmuls, f32 accum/epilogue."""
    def dense(h, w, b):
        return jnp.dot(h.astype(jnp.bfloat16), w.astype(jnp.bfloat16),
                       preferred_element_type=jnp.float32) + b
    h = jnp.maximum(dense(x, params["w1"], params["b1"]), 0.0)
    h = jnp.maximum(dense(h, params["w2"], params["b2"]), 0.0)
    h = jnp.maximum(dense(h, params["w3"], params["b3"]), 0.0)
    return dense(h, params["w4"], params["b4"])


if __name__ == "__main__":
    # Shapes consistent with Qnetwork.forward: state is (batch, input_dims).
    # batch=256 gives a 2-step batch grid (2 tiles of 128 rows) so the pipeline /
    # dual-TC path is actually exercised; features stay at the module's small sizes.
    batch = 256
    input_dims = 16
    hidden_nodes = 32
    n_actions = 8

    key = jax.random.PRNGKey(0)
    pkey, xkey = jax.random.split(key)

    params = init_qnetwork_params(pkey, input_dims, n_actions, hidden_nodes)
    state = jax.random.normal(xkey, (batch, input_dims), dtype=jnp.float32)

    out = qnetwork_forward(state, params)
    out = jax.block_until_ready(out)
    assert out.shape == (batch, n_actions)

    # Tight check against a reference doing the exact same mixed-precision math.
    ref_mixed = qnetwork_forward_ref_mixed(state, params)
    assert jnp.allclose(out, ref_mixed, atol=2e-3, rtol=2e-3), \
        float(jnp.max(jnp.abs(out - ref_mixed)))

    # Loose sanity check against the pure-f32 PyTorch-equivalent math.
    ref_f32 = qnetwork_forward_ref(state, params)
    assert jnp.allclose(out, ref_f32, atol=5e-2, rtol=5e-2), \
        float(jnp.max(jnp.abs(out - ref_f32)))

    print("KERNEL_OK")
</pallas_src>

<mosaic_0001>
module attributes {stable_mosaic.version = 11 : i64} {
  func.func @_qnet_kernel(%arg0: i32, %arg1: memref<128x128xbf16, #tpu.memory_space<vmem>>, %arg2: memref<128x128xbf16, #tpu.memory_space<vmem>>, %arg3: memref<1x128xf32, #tpu.memory_space<vmem>>, %arg4: memref<128x128xbf16, #tpu.memory_space<vmem>>, %arg5: memref<1x128xf32, #tpu.memory_space<vmem>>, %arg6: memref<128x128xbf16, #tpu.memory_space<vmem>>, %arg7: memref<1x128xf32, #tpu.memory_space<vmem>>, %arg8: memref<128x128xbf16, #tpu.memory_space<vmem>>, %arg9: memref<1x128xf32, #tpu.memory_space<vmem>>, %arg10: memref<128x128xf32, #tpu.memory_space<vmem>>) attributes {dimension_semantics = [#tpu.dimension_semantics<parallel>], iteration_bounds = array<i64: 2>, scalar_prefetch = 0 : i64, scratch_operands = 0 : i64, tpu.core_type = #tpu.core_type<tc>, window_params = [{transform_indices = @transform_0, window_bounds = array<i64: 128, 128>}, {pipeline_mode = #tpu.pipeline_mode<synchronous>, transform_indices = @transform_1, window_bounds = array<i64: 128, 128>}, {pipeline_mode = #tpu.pipeline_mode<synchronous>, transform_indices = @transform_2, window_bounds = array<i64: 1, 128>}, {pipeline_mode = #tpu.pipeline_mode<synchronous>, transform_indices = @transform_3, window_bounds = array<i64: 128, 128>}, {pipeline_mode = #tpu.pipeline_mode<synchronous>, transform_indices = @transform_4, window_bounds = array<i64: 1, 128>}, {pipeline_mode = #tpu.pipeline_mode<synchronous>, transform_indices = @transform_5, window_bounds = array<i64: 128, 128>}, {pipeline_mode = #tpu.pipeline_mode<synchronous>, transform_indices = @transform_6, window_bounds = array<i64: 1, 128>}, {pipeline_mode = #tpu.pipeline_mode<synchronous>, transform_indices = @transform_7, window_bounds = array<i64: 128, 128>}, {pipeline_mode = #tpu.pipeline_mode<synchronous>, transform_indices = @transform_8, window_bounds = array<i64: 1, 128>}, {transform_indices = @transform_9, window_bounds = array<i64: 128, 128>}]} {
    %c0 = arith.constant 0 : index
    %c0_0 = arith.constant 0 : index
    %0 = vector.load %arg1[%c0, %c0_0] : memref<128x128xbf16, #tpu.memory_space<vmem>>, vector<128x128xbf16>
    %c0_1 = arith.constant 0 : index
    %c0_2 = arith.constant 0 : index
    %1 = vector.load %arg2[%c0_1, %c0_2] : memref<128x128xbf16, #tpu.memory_space<vmem>>, vector<128x128xbf16>
    %cst = arith.constant dense<0.000000e+00> : vector<128x128xf32>
    %2 = tpu.matmul %0, %1, %cst {dimension_numbers = #tpu.dot_dimension_numbers<[1], [0], [0], [1], [0, 0, 1, 1], [], []>} : vector<128x128xbf16>, vector<128x128xbf16>, vector<128x128xf32> -> vector<128x128xf32>
    %c0_3 = arith.constant 0 : index
    %c0_4 = arith.constant 0 : index
    %3 = vector.load %arg3[%c0_3, %c0_4] : memref<1x128xf32, #tpu.memory_space<vmem>>, vector<1x128xf32>
    %4 = vector.broadcast %3 : vector<1x128xf32> to vector<128x128xf32>
    %5 = arith.addf %2, %4 : vector<128x128xf32>
    %cst_5 = arith.constant 0.000000e+00 : f32
    %6 = vector.broadcast %cst_5 : f32 to vector<128x128xf32>
    %7 = arith.maximumf %5, %6 : vector<128x128xf32>
    %8 = arith.truncf %7 : vector<128x128xf32> to vector<128x128xbf16>
    %c0_6 = arith.constant 0 : index
    %c0_7 = arith.constant 0 : index
    %9 = vector.load %arg4[%c0_6, %c0_7] : memref<128x128xbf16, #tpu.memory_space<vmem>>, vector<128x128xbf16>
    %cst_8 = arith.constant dense<0.000000e+00> : vector<128x128xf32>
    %10 = tpu.matmul %8, %9, %cst_8 {dimension_numbers = #tpu.dot_dimension_numbers<[1], [0], [0], [1], [0, 0, 1, 1], [], []>} : vector<128x128xbf16>, vector<128x128xbf16>, vector<128x128xf32> -> vector<128x128xf32>
    %c0_9 = arith.constant 0 : index
    %c0_10 = arith.constant 0 : index
    %11 = vector.load %arg5[%c0_9, %c0_10] : memref<1x128xf32, #tpu.memory_space<vmem>>, vector<1x128xf32>
    %12 = vector.broadcast %11 : vector<1x128xf32> to vector<128x128xf32>
    %13 = arith.addf %10, %12 : vector<128x128xf32>
    %cst_11 = arith.constant 0.000000e+00 : f32
    %14 = vector.broadcast %cst_11 : f32 to vector<128x128xf32>
    %15 = arith.maximumf %13, %14 : vector<128x128xf32>
    %16 = arith.truncf %15 : vector<128x128xf32> to vector<128x128xbf16>
    %c0_12 = arith.constant 0 : index
    %c0_13 = arith.constant 0 : index
    %17 = vector.load %arg6[%c0_12, %c0_13] : memref<128x128xbf16, #tpu.memory_space<vmem>>, vector<128x128xbf16>
    %cst_14 = arith.constant dense<0.000000e+00> : vector<128x128xf32>
    %18 = tpu.matmul %16, %17, %cst_14 {dimension_numbers = #tpu.dot_dimension_numbers<[1], [0], [0], [1], [0, 0, 1, 1], [], []>} : vector<128x128xbf16>, vector<128x128xbf16>, vector<128x128xf32> -> vector<128x128xf32>
    %c0_15 = arith.constant 0 : index
    %c0_16 = arith.constant 0 : index
    %19 = vector.load %arg7[%c0_15, %c0_16] : memref<1x128xf32, #tpu.memory_space<vmem>>, vector<1x128xf32>
    %20 = vector.broadcast %19 : vector<1x128xf32> to vector<128x128xf32>
    %21 = arith.addf %18, %20 : vector<128x128xf32>
    %cst_17 = arith.constant 0.000000e+00 : f32
    %22 = vector.broadcast %cst_17 : f32 to vector<128x128xf32>
    %23 = arith.maximumf %21, %22 : vector<128x128xf32>
    %24 = arith.truncf %23 : vector<128x128xf32> to vector<128x128xbf16>
    %c0_18 = arith.constant 0 : index
    %c0_19 = arith.constant 0 : index
    %25 = vector.load %arg8[%c0_18, %c0_19] : memref<128x128xbf16, #tpu.memory_space<vmem>>, vector<128x128xbf16>
    %cst_20 = arith.constant dense<0.000000e+00> : vector<128x128xf32>
    %26 = tpu.matmul %24, %25, %cst_20 {dimension_numbers = #tpu.dot_dimension_numbers<[1], [0], [0], [1], [0, 0, 1, 1], [], []>} : vector<128x128xbf16>, vector<128x128xbf16>, vector<128x128xf32> -> vector<128x128xf32>
    %c0_21 = arith.constant 0 : index
    %c0_22 = arith.constant 0 : index
    %27 = vector.load %arg9[%c0_21, %c0_22] : memref<1x128xf32, #tpu.memory_space<vmem>>, vector<1x128xf32>
    %28 = vector.broadcast %27 : vector<1x128xf32> to vector<128x128xf32>
    %29 = arith.addf %26, %28 : vector<128x128xf32>
    %c0_23 = arith.constant 0 : index
    %c0_24 = arith.constant 0 : index
    %30 = vector.load %arg10[%c0_23, %c0_24] : memref<128x128xf32, #tpu.memory_space<vmem>>, vector<128x128xf32>
    tpu.vector_store %arg10[%c0_23, %c0_24], %29 {strides = array<i32>} : memref<128x128xf32, #tpu.memory_space<vmem>>, vector<128x128xf32>,
    return
  }
  func.func @transform_0(%arg0: i32) -> (i32, i32) {
    %c0_i32 = arith.constant 0 : i32
    %c0_i32_0 = arith.constant 0 : i32
    return %arg0, %c0_i32 : i32, i32
  }
  func.func @transform_1(%arg0: i32) -> (i32, i32) {
    %c0_i32 = arith.constant 0 : i32
    %c0_i32_0 = arith.constant 0 : i32
    %c0_i32_1 = arith.constant 0 : i32
    return %c0_i32, %c0_i32_0 : i32, i32
  }
  func.func @transform_2(%arg0: i32) -> (i32, i32) {
    %c0_i32 = arith.constant 0 : i32
    %c0_i32_0 = arith.constant 0 : i32
    %c0_i32_1 = arith.constant 0 : i32
    return %c0_i32, %c0_i32_0 : i32, i32
  }
  func.func @transform_3(%arg0: i32) -> (i32, i32) {
    %c0_i32 = arith.constant 0 : i32
    %c0_i32_0 = arith.constant 0 : i32
    %c0_i32_1 = arith.constant 0 : i32
    return %c0_i32, %c0_i32_0 : i32, i32
  }
  func.func @transform_4(%arg0: i32) -> (i32, i32) {
    %c0_i32 = arith.constant 0 : i32
    %c0_i32_0 = arith.constant 0 : i32
    %c0_i32_1 = arith.constant 0 : i32
    return %c0_i32, %c0_i32_0 : i32, i32
  }
  func.func @transform_5(%arg0: i32) -> (i32, i32) {
    %c0_i32 = arith.constant 0 : i32
    %c0_i32_0 = arith.constant 0 : i32
    %c0_i32_1 = arith.constant 0 : i32
    return %c0_i32, %c0_i32_0 : i32, i32
  }
  func.func @transform_6(%arg0: i32) -> (i32, i32) {
    %c0_i32 = arith.constant 0 : i32
    %c0_i32_0 = arith.constant 0 : i32
    %c0_i32_1 = arith.constant 0 : i32
    return %c0_i32, %c0_i32_0 : i32, i32
  }
  func.func @transform_7(%arg0: i32) -> (i32, i32) {
    %c0_i32 = arith.constant 0 : i32
    %c0_i32_0 = arith.constant 0 : i32
    %c0_i32_1 = arith.constant 0 : i32
    return %c0_i32, %c0_i32_0 : i32, i32
  }
  func.func @transform_8(%arg0: i32) -> (i32, i32) {
    %c0_i32 = arith.constant 0 : i32
    %c0_i32_0 = arith.constant 0 : i32
    %c0_i32_1 = arith.constant 0 : i32
    return %c0_i32, %c0_i32_0 : i32, i32
  }
  func.func @transform_9(%arg0: i32) -> (i32, i32) {
    %c0_i32 = arith.constant 0 : i32
    %c0_i32_0 = arith.constant 0 : i32
    return %arg0, %c0_i32 : i32, i32
  }
}

</mosaic_0001>

<bundles_post_ra>
// kernel: qnetwork_forward.1
= control target key start
LH: loop header
LB: loop body
LE: loop exit
PB: predicated region body
PF: predicated region fallthrough
CT: control target
= control target key end

     0   :  { %s1570_s30 = smov 0   ;;  %s1727_s0 = inlined_call_operand.vmem [shape: bf16[256,128], index: 0, kind: input, shape index: {}]   ;;  %s1728_s1 = inlined_call_operand.vmem [shape: bf16[128,128], index: 1, kind: input, shape index: {}]   ;;  %s1729_s2 = inlined_call_operand.vmem [shape: f32[1,128], index: 2, kind: input, shape index: {}]   ;;  %s1730_s3 = inlined_call_operand.vmem [shape: bf16[128,128], index: 3, kind: input, shape index: {}]   ;;  %s1731_s4 = inlined_call_operand.vmem [shape: f32[1,128], index: 4, kind: input, shape index: {}]   ;;  %s1732_s5 = inlined_call_operand.vmem [shape: bf16[128,128], index: 5, kind: input, shape index: {}]   ;;  %s1733_s6 = inlined_call_operand.vmem [shape: f32[1,128], index: 6, kind: input, shape index: {}]   ;;  %s1734_s7 = inlined_call_operand.vmem [shape: bf16[128,128], index: 7, kind: input, shape index: {}]   ;;  %s1735_s8 = inlined_call_operand.vmem [shape: f32[1,128], index: 8, kind: input, shape index: {}]   ;;  %s1736_s9 = inlined_call_operand.vmem [shape: f32[256,128], index: 9, kind: output, shape index: {}]  }
   0x1 LB: > { %s1217_s10 = sadd.s32 4294967295, %s1518_s30   ;;  %p1221_p0 = scmp.ge.s32.totalorder %s1518_s30, 1  ;;  %s1518_s30 = sphi %s1570_s30, %s19_s30  }
   0x2   : > { %p288_p1 = scmp.lt.s32.totalorder %s1518_s30, 3 }
   0x4   : > { %p289_p2 = pnand %p1221_p0, %p288_p1 }
   0x5   : > { %v1472_v0 = vld [vmem:[%s1728_s1] sm:$0xff] (!%p289_p2)   ;;  %s1222_s13 = sshll.u32 (!%p289_p2), %s1217_s10, 4  ;;  %v1473_v1 = vld [vmem:[%s1728_s1 + $0x8] sm:$0xff] (!%p289_p2)   ;;  %v1474_v2 = vld [vmem:[%s1728_s1 + $0x10] sm:$0xff] (!%p289_p2)  }
   0x6   : > { %292 = sbr.rel (%p289_p2) target bundleno = 946 (0x3b2), region = 56  ;;  %p325_p3 = scmp.lt.s32.totalorder (!%p289_p2), %s1222_s13, 31  ;;  %1336 = vmatprep.subr.bf16.mxu0 (!%p289_p2), %v1472_v0  ;;  %v1475_v3 = vld [vmem:[%s1728_s1 + $0x18] sm:$0xff] (!%p289_p2)   ;;  %v1476_v5 = vld [vmem:[%s1728_s1 + $0x20] sm:$0xff] (!%p289_p2)   ;;  %v1477_v6 = vld [vmem:[%s1728_s1 + $0x28] sm:$0xff] (!%p289_p2)  }
   0x7   : > { %1337 = vmatpush3.bf16.msra.mxu0 (!%p289_p2), %v1472_v0  ;;  %v1488_v7 = vld [vmem:[%s1730_s3] sm:$0xff] (!%p289_p2)   ;;  %v1489_v8 = vld [vmem:[%s1730_s3 + $0x8] sm:$0xff] (!%p289_p2)   ;;  %v1478_v9 = vld [vmem:[%s1728_s1 + $0x30] sm:$0xff] (!%p289_p2)  }
   0x8   : > { %1338 = vmatprep.subr.bf16.mxu0 (!%p289_p2), %v1473_v1  ;;  %1368 = vmatprep.subr.bf16.mxu1 (!%p289_p2), %v1488_v7  ;;  %v1490_v10 = vld [vmem:[%s1730_s3 + $0x10] sm:$0xff] (!%p289_p2)   ;;  %v1479_v11 = vld [vmem:[%s1728_s1 + $0x38] sm:$0xff] (!%p289_p2)   ;;  %v1492_v13 = vld [vmem:[%s1730_s3 + $0x20] sm:$0xff] (!%p289_p2)  }
   0x9   : > { %1369 = vmatpush3.bf16.msra.mxu1 (!%p289_p2), %v1488_v7  ;;  %v1491_v12 = vld [vmem:[%s1730_s3 + $0x18] sm:$0xff] (!%p289_p2)   ;;  %v1493_v16 = vld [vmem:[%s1730_s3 + $0x28] sm:$0xff] (!%p289_p2)   ;;  %v1494_v22 = vld [vmem:[%s1730_s3 + $0x30] sm:$0xff] (!%p289_p2)  }
   0xa   : > { %1370 = vmatprep.subr.bf16.mxu1 (!%p289_p2), %v1489_v8  ;;  %v1495_v23 = vld [vmem:[%s1730_s3 + $0x38] sm:$0xff] (!%p289_p2)   ;;  %v1496_v24 = vld [vmem:[%s1732_s5] sm:$0xff] (!%p289_p2)   ;;  %v1497_v25 = vld [vmem:[%s1732_s5 + $0x8] sm:$0xff] (!%p289_p2)  }
   0xb   : > { %1339 = vmatpush3.bf16.msra.mxu0 (!%p289_p2), %v1473_v1  ;;  %v1498_v26 = vld [vmem:[%s1732_s5 + $0x10] sm:$0xff] (!%p289_p2)   ;;  %v1499_v27 = vld [vmem:[%s1732_s5 + $0x18] sm:$0xff] (!%p289_p2)   ;;  %v1500_v28 = vld [vmem:[%s1732_s5 + $0x20] sm:$0xff] (!%p289_p2)  }
   0xc   : > { %1340 = vmatprep.subr.bf16.mxu0 (!%p289_p2), %v1474_v2  ;;  %v1501_v29 = vld [vmem:[%s1732_s5 + $0x28] sm:$0xff] (!%p289_p2)   ;;  %v1226_v30 = vld [vmem:[%s1729_s2] ss:$0 sm:$0xff] (!%p289_p2) }
   0xd   : > { %s1738_s13 = smov (!%p325_p3, %s1222_s13), 31  ;;  %1371 = vmatpush3.bf16.msra.mxu1 %v1489_v8 }
   0xe   : > { %s1223_s18 = sshll.u32 %s1738_s13, 2  ;;  %1372 = vmatprep.subr.bf16.mxu1 %v1490_v10  ;;  %s1225_s10 = sshll.u32 %s1738_s13, 3 }
   0xf   : > { %s1593_s21 = scalar_lea.vmem %s1727_s0, %s1223_s18  ;;  %1341 = vmatpush3.bf16.msra.mxu0 %v1474_v2  ;;  %s1706_s15 = scalar_lea.vmem %s1736_s9, %s1225_s10 }
  0x10   : > { %v1480_v4 = vld [vmem:[%s1593_s21] sm:$0xff]   ;;  %1342 = vmatprep.subr.bf16.mxu0 %v1475_v3  ;;  %v1481_v14 = vld [vmem:[%s1593_s21 + $0x8] sm:$0xff]   ;;  %v1482_v15 = vld [vmem:[%s1593_s21 + $0x10] sm:$0xff]  }
  0x11   : > { %1352 = vmatprep.mubr.bf16.mxu0 %v1480_v4  ;;  %1373 = vmatpush3.bf16.msra.mxu1 %v1490_v10  ;;  %v1483_v17 = vld [vmem:[%s1593_s21 + $0x18] sm:$0xff]   ;;  %v1484_v18 = vld [vmem:[%s1593_s21 + $0x20] sm:$0xff]   ;;  %v1485_v19 = vld [vmem:[%s1593_s21 + $0x28] sm:$0xff]  }
  0x12   : > { %1374 = vmatprep.subr.bf16.mxu1 %v1491_v12  ;;  %v1486_v20 = vld [vmem:[%s1593_s21 + $0x30] sm:$0xff]   ;;  %v1487_v21 = vld [vmem:[%s1593_s21 + $0x38] sm:$0xff]  }
  0x13   : > { %1343 = vmatpush3.bf16.msra.mxu0 %v1475_v3 }
  0x14   : > { %1344 = vmatprep.subr.bf16.mxu0 %v1476_v5 }
  0x15   : > { %1375 = vmatpush3.bf16.msra.mxu1 %v1491_v12 }
  0x16   : > { %1376 = vmatprep.subr.bf16.mxu1 %v1492_v13 }
  0x17   : > { %1345 = vmatpush3.bf16.msra.mxu0 %v1476_v5 }
  0x18   : > { %1346 = vmatprep.subr.bf16.mxu0 %v1477_v6 }
  0x19   : > { %1377 = vmatpush3.bf16.msra.mxu1 %v1492_v13 }
  0x1a   : > { %1378 = vmatprep.subr.bf16.mxu1 %v1493_v16 }
  0x1b   : > { %1347 = vmatpush3.bf16.msra.mxu0 %v1477_v6 }
  0x1c   : > { %1348 = vmatprep.subr.bf16.mxu0 %v1478_v9 }
  0x1d   : > { %1379 = vmatpush3.bf16.msra.mxu1 %v1493_v16 }
  0x1e   : > { %1380 = vmatprep.subr.bf16.mxu1 %v1494_v22 }
  0x1f   : > { %1349 = vmatpush3.bf16.msra.mxu0 %v1478_v9 }
  0x20   : > { %1350 = vmatprep.subr.bf16.mxu0 %v1479_v11 }
  0x21   : > { %1381 = vmatpush3.bf16.msra.mxu1 %v1494_v22 }
  0x22   : > { %1382 = vmatprep.subr.bf16.mxu1 %v1495_v23 }
  0x23   : > { %1351 = vmatpush3.bf16.msra.mxu0 %v1479_v11 }
  0x24   : > { %1400 = vmatprep.subr.bf16.mxu0 %v1496_v24 }
  0x25   : > { %1383 = vmatpush3.bf16.msra.mxu1 %v1495_v23  ;;  %v1502_v23 = vld [vmem:[%s1732_s5 + $0x30] sm:$0xff]  }
  0x26   : > { %1353 = vmatmul.mubr.bf16.vlgmr.msra.gmra.mrb[0].mxu0 %v1481_v14 }
  0x27   : > { %1356 = vmatprep.mubr.bf16.mxu0 %v1482_v15  ;;  %1401 = vmatpush3.bf16.msra.mxu0 %v1496_v24  ;;  %v1503_v24 = vld [vmem:[%s1732_s5 + $0x38] sm:$0xff]  }
  0x28   : > { %1402 = vmatprep.subr.bf16.mxu0 %v1497_v25 }
  0x2b   : > { %1403 = vmatpush3.bf16.msra.mxu0 %v1497_v25  ;;  %v1504_v25 = vld [vmem:[%s1734_s7] sm:$0xff]  }
  0x2c   : > { %1404 = vmatprep.subr.bf16.mxu0 %v1498_v26  ;;  %1432 = vmatprep.subr.bf16.mxu1 %v1504_v25 }
  0x2e   : > { %1357 = vmatmul.mubr.bf16.gmra.mrb[4].mxu0 %v1483_v17 }
  0x2f   : > { %1360 = vmatprep.mubr.bf16.mxu0 %v1484_v18  ;;  %1405 = vmatpush3.bf16.msra.mxu0 %v1498_v26  ;;  %v1505_v26 = vld [vmem:[%s1734_s7 + $0x8] sm:$0xff]  }
  0x30   : > { %1406 = vmatprep.subr.bf16.mxu0 %v1499_v27 }
  0x33   : > { %1407 = vmatpush3.bf16.msra.mxu0 %v1499_v27  ;;  %v1506_v27 = vld [vmem:[%s1734_s7 + $0x10] sm:$0xff]  }
  0x34   : > { %1408 = vmatprep.subr.bf16.mxu0 %v1500_v28 }
  0x36   : > { %1361 = vmatmul.mubr.bf16.gmra.mrb[8].mxu0 %v1485_v19 }
  0x37   : > { %1364 = vmatprep.mubr.bf16.mxu0 %v1486_v20  ;;  %1409 = vmatpush3.bf16.msra.mxu0 %v1500_v28  ;;  %v1507_v28 = vld [vmem:[%s1734_s7 + $0x18] sm:$0xff]  }
  0x38   : > { %1410 = vmatprep.subr.bf16.mxu0 %v1501_v29 }
  0x3b   : > { %1411 = vmatpush3.bf16.msra.mxu0 %v1501_v29  ;;  %v1508_v29 = vld [vmem:[%s1734_s7 + $0x20] sm:$0xff]  }
  0x3c   : > { %1412 = vmatprep.subr.bf16.mxu0 %v1502_v23 }
  0x3e   : > { %1365 = vmatmul.mubr.bf16.gmra.mrb[12].mxu0 %v1487_v21 }
  0x3f   : > { %1413 = vmatpush3.bf16.msra.mxu0 %v1502_v23 }
  0x40   : > { %1414 = vmatprep.subr.bf16.mxu0 %v1503_v24 }
  0x43   : > { %1415 = vmatpush3.bf16.msra.mxu0 %v1503_v24  ;;  %v1510_v24 = vld [vmem:[%s1734_s7 + $0x30] sm:$0xff]  }
  0xf9   : > { %v1354_v31 = vpop.f32.mrb[0].mxu0 }
  0xfa   : > { %v515_v32 = vadd.f32 %v1354_v31, %v1226_v30  ;;  %v506_v33 = vpop.f32.mrb[1].mxu0  ;;  %v1243_v31 = vld [vmem:[%s1731_s4] ss:$0 sm:$0xff] }
  0xfb   : > { %v507_v34 = vadd.f32 %v1226_v30, %v506_v33  ;;  %v1355_v35 = vpop.f32.mrb[2].mxu0 }
  0xfc   : > { %v518_v36 = vadd.f32 %v1355_v35, %v1226_v30  ;;  %v509_v37 = vpop.f32.mrb[3].mxu0  ;;  %v571_v39 = vmax.f32 %v515_v32, 0.0 }
  0xfd   : > { %v510_v38 = vadd.f32 %v1226_v30, %v509_v37  ;;  %v569_v41 = vmax.f32 %v507_v34, 0.0 }
  0xfe   : > { %v572_v40 = vmax.f32 %v518_v36, 0.0 }
  0xff   : > { %v570_v42 = vmax.f32 %v510_v38, 0.0 }
 0x100   : > { %v586_v43 = vpack.c.bf16 %v572_v40, %v571_v39 }
 0x101   : > { %v1358_v44 = vpop.f32.mrb[4].mxu0  ;;  %v585_v45 = vpack.c.bf16 %v570_v42, %v569_v41 }
 0x102   : > { %v531_v46 = vadd.f32 %v1358_v44, %v1226_v30  ;;  %v522_v47 = vpop.f32.mrb[5].mxu0 }
 0x103   : > { %v523_v48 = vadd.f32 %v1226_v30, %v522_v47  ;;  %v1359_v49 = vpop.f32.mrb[6].mxu0  ;;  %1384 = vmatprep.mubr.bf16.mxu1 %v585_v45 }
 0x104   : > { %v534_v50 = vadd.f32 %v1359_v49, %v1226_v30  ;;  %v525_v51 = vpop.f32.mrb[7].mxu0  ;;  %1385 = vmatmul.mubr.bf16.vlgmr.msra.gmra.mrb[0].mxu1 %v586_v43  ;;  %v575_v53 = vmax.f32 %v531_v46, 0.0 }
 0x105   : > { %v526_v52 = vadd.f32 %v1226_v30, %v525_v51  ;;  %v573_v55 = vmax.f32 %v523_v48, 0.0  ;;  %1433 = vmatpush3.bf16.msra.mxu1 %v1504_v25  ;;  %v1511_v25 = vld [vmem:[%s1734_s7 + $0x38] sm:$0xff]  }
 0x106   : > { %v576_v54 = vmax.f32 %v534_v50, 0.0  ;;  %1434 = vmatprep.subr.bf16.mxu1 %v1505_v26 }
 0x107   : > { %v574_v56 = vmax.f32 %v526_v52, 0.0 }
 0x108   : > { %v588_v57 = vpack.c.bf16 %v576_v54, %v575_v53 }
 0x109   : > { %v587_v58 = vpack.c.bf16 %v574_v56, %v573_v55  ;;  %v1362_v59 = vpop.f32.mrb[8].mxu0  ;;  %1435 = vmatpush3.bf16.msra.mxu1 %v1505_v26  ;;  %v1252_v26 = vld [vmem:[%s1733_s6] ss:$0 sm:$0xff] }
 0x10a   : > { %v547_v60 = vadd.f32 %v1362_v59, %v1226_v30  ;;  %v538_v61 = vpop.f32.mrb[9].mxu0  ;;  %1436 = vmatprep.subr.bf16.mxu1 %v1506_v27 }
 0x10b   : > { %v539_v62 = vadd.f32 %v1226_v30, %v538_v61  ;;  %v1363_v63 = vpop.f32.mrb[10].mxu0  ;;  %1388 = vmatprep.mubr.bf16.mxu1 %v587_v58 }
 0x10c   : > { %v550_v0 = vadd.f32 %v1363_v63, %v1226_v30  ;;  %v541_v1 = vpop.f32.mrb[11].mxu0  ;;  %1389 = vmatmul.mubr.bf16.gmra.mrb[4].mxu1 %v588_v57  ;;  %v579_v3 = vmax.f32 %v547_v60, 0.0 }
 0x10d   : > { %v542_v2 = vadd.f32 %v1226_v30, %v541_v1  ;;  %v577_v5 = vmax.f32 %v539_v62, 0.0  ;;  %1437 = vmatpush3.bf16.msra.mxu1 %v1506_v27 }
 0x10e   : > { %v580_v4 = vmax.f32 %v550_v0, 0.0  ;;  %1438 = vmatprep.subr.bf16.mxu1 %v1507_v28 }
 0x10f   : > { %v578_v6 = vmax.f32 %v542_v2, 0.0 }
 0x110   : > { %v590_v7 = vpack.c.bf16 %v580_v4, %v579_v3 }
 0x111   : > { %v589_v8 = vpack.c.bf16 %v578_v6, %v577_v5  ;;  %v1366_v9 = vpop.f32.mrb[12].mxu0  ;;  %1439 = vmatpush3.bf16.msra.mxu1 %v1507_v28 }
 0x112   : > { %v563_v10 = vadd.f32 %v1366_v9, %v1226_v30  ;;  %v554_v11 = vpop.f32.mrb[13].mxu0  ;;  %1440 = vmatprep.subr.bf16.mxu1 %v1508_v29 }
 0x113   : > { %v555_v12 = vadd.f32 %v1226_v30, %v554_v11  ;;  %v1367_v13 = vpop.f32.mrb[14].mxu0  ;;  %1392 = vmatprep.mubr.bf16.mxu1 %v589_v8 }
 0x114   : > { %v566_v14 = vadd.f32 %v1367_v13, %v1226_v30  ;;  %v557_v15 = vpop.f32.mrb[15].mxu0  ;;  %1393 = vmatmul.mubr.bf16.gmra.mrb[8].mxu1 %v590_v7  ;;  %v583_v17 = vmax.f32 %v563_v10, 0.0 }
 0x115   : > { %v558_v16 = vadd.f32 %v1226_v30, %v557_v15  ;;  %v581_v19 = vmax.f32 %v555_v12, 0.0  ;;  %v1509_v30 = vld [vmem:[%s1734_s7 + $0x28] sm:$0xff]   ;;  %1441 = vmatpush3.bf16.msra.mxu1 %v1508_v29 }
 0x116   : > { %v584_v18 = vmax.f32 %v566_v14, 0.0  ;;  %1442 = vmatprep.subr.bf16.mxu1 %v1509_v30 }
 0x117   : > { %v582_v20 = vmax.f32 %v558_v16, 0.0 }
 0x118   : > { %v592_v21 = vpack.c.bf16 %v584_v18, %v583_v17 }
 0x119   : > { %v591_v22 = vpack.c.bf16 %v582_v20, %v581_v19  ;;  %1443 = vmatpush3.bf16.msra.mxu1 %v1509_v30 }
 0x11a   : > { %1444 = vmatprep.subr.bf16.mxu1 %v1510_v24 }
 0x11b   : > { %1396 = vmatprep.mubr.bf16.mxu1 %v591_v22 }
 0x11c   : > { %1397 = vmatmul.mubr.bf16.gmra.mrb[12].mxu1 %v592_v21 }
 0x11d   : > { %1445 = vmatpush3.bf16.msra.mxu1 %v1510_v24 }
 0x11e   : > { %1446 = vmatprep.subr.bf16.mxu1 %v1511_v25 }
 0x121   : > { %1447 = vmatpush3.bf16.msra.mxu1 %v1511_v25 }
 0x1d7   : > { %v1386_v32 = vpop.f32.mrb[0].mxu1 }
 0x1d8   : > { %v707_v33 = vadd.f32 %v1386_v32, %v1243_v31  ;;  %v698_v34 = vpop.f32.mrb[1].mxu1 }
 0x1d9   : > { %v699_v35 = vadd.f32 %v1243_v31, %v698_v34  ;;  %v1387_v36 = vpop.f32.mrb[2].mxu1 }
 0x1da   : > { %v710_v37 = vadd.f32 %v1387_v36, %v1243_v31  ;;  %v701_v38 = vpop.f32.mrb[3].mxu1  ;;  %v763_v40 = vmax.f32 %v707_v33, 0.0 }
 0x1db   : > { %v702_v39 = vadd.f32 %v1243_v31, %v701_v38  ;;  %v761_v42 = vmax.f32 %v699_v35, 0.0 }
 0x1dc   : > { %v764_v41 = vmax.f32 %v710_v37, 0.0 }
 0x1dd   : > { %v762_v43 = vmax.f32 %v702_v39, 0.0 }
 0x1de   : > { %v778_v44 = vpack.c.bf16 %v764_v41, %v763_v40 }
 0x1df   : > { %v777_v45 = vpack.c.bf16 %v762_v43, %v761_v42  ;;  %v1390_v46 = vpop.f32.mrb[4].mxu1 }
 0x1e0   : > { %v723_v47 = vadd.f32 %v1390_v46, %v1243_v31  ;;  %v714_v48 = vpop.f32.mrb[5].mxu1 }
 0x1e1   : > { %v715_v49 = vadd.f32 %v1243_v31, %v714_v48  ;;  %v1391_v50 = vpop.f32.mrb[6].mxu1  ;;  %1416 = vmatprep.mubr.bf16.mxu0 %v777_v45 }
 0x1e2   : > { %v726_v51 = vadd.f32 %v1391_v50, %v1243_v31  ;;  %v717_v52 = vpop.f32.mrb[7].mxu1  ;;  %1417 = vmatmul.mubr.bf16.vlgmr.msra.gmra.mrb[16].mxu0 %v778_v44  ;;  %v767_v54 = vmax.f32 %v723_v47, 0.0 }
 0x1e3   : > { %v718_v53 = vadd.f32 %v1243_v31, %v717_v52  ;;  %v765_v56 = vmax.f32 %v715_v49, 0.0 }
 0x1e4   : > { %v768_v55 = vmax.f32 %v726_v51, 0.0 }
 0x1e5   : > { %v766_v57 = vmax.f32 %v718_v53, 0.0 }
 0x1e6   : > { %v780_v58 = vpack.c.bf16 %v768_v55, %v767_v54 }
 0x1e7   : > { %v779_v59 = vpack.c.bf16 %v766_v57, %v765_v56  ;;  %v1394_v60 = vpop.f32.mrb[8].mxu1 }
 0x1e8   : > { %v739_v61 = vadd.f32 %v1394_v60, %v1243_v31  ;;  %v730_v62 = vpop.f32.mrb[9].mxu1 }
 0x1e9   : > { %v731_v63 = vadd.f32 %v1243_v31, %v730_v62  ;;  %v1395_v0 = vpop.f32.mrb[10].mxu1  ;;  %1420 = vmatprep.mubr.bf16.mxu0 %v779_v59 }
 0x1ea   : > { %v742_v1 = vadd.f32 %v1395_v0, %v1243_v31  ;;  %v733_v2 = vpop.f32.mrb[11].mxu1  ;;  %1421 = vmatmul.mubr.bf16.gmra.mrb[20].mxu0 %v780_v58  ;;  %v771_v4 = vmax.f32 %v739_v61, 0.0 }
 0x1eb   : > { %v734_v3 = vadd.f32 %v1243_v31, %v733_v2  ;;  %v769_v6 = vmax.f32 %v731_v63, 0.0 }
 0x1ec   : > { %v772_v5 = vmax.f32 %v742_v1, 0.0 }
 0x1ed   : > { %v770_v7 = vmax.f32 %v734_v3, 0.0 }
 0x1ee   : > { %v782_v8 = vpack.c.bf16 %v772_v5, %v771_v4 }
 0x1ef   : > { %v781_v9 = vpack.c.bf16 %v770_v7, %v769_v6  ;;  %v1398_v10 = vpop.f32.mrb[12].mxu1 }
 0x1f0   : > { %v755_v11 = vadd.f32 %v1398_v10, %v1243_v31  ;;  %v746_v12 = vpop.f32.mrb[13].mxu1 }
 0x1f1   : > { %v747_v13 = vadd.f32 %v1243_v31, %v746_v12  ;;  %v1399_v14 = vpop.f32.mrb[14].mxu1  ;;  %1424 = vmatprep.mubr.bf16.mxu0 %v781_v9 }
 0x1f2   : > { %v758_v15 = vadd.f32 %v1399_v14, %v1243_v31  ;;  %v749_v16 = vpop.f32.mrb[15].mxu1  ;;  %1425 = vmatmul.mubr.bf16.gmra.mrb[24].mxu0 %v782_v8  ;;  %v775_v18 = vmax.f32 %v755_v11, 0.0 }
 0x1f3   : > { %v750_v17 = vadd.f32 %v1243_v31, %v749_v16  ;;  %v773_v20 = vmax.f32 %v747_v13, 0.0 }
 0x1f4   : > { %v776_v19 = vmax.f32 %v758_v15, 0.0 }
 0x1f5   : > { %v774_v21 = vmax.f32 %v750_v17, 0.0 }
 0x1f6   : > { %v784_v22 = vpack.c.bf16 %v776_v19, %v775_v18  ;;  %v1261_v19 = vld [vmem:[%s1735_s8] ss:$0 sm:$0xff] }
 0x1f7   : > { %v783_v23 = vpack.c.bf16 %v774_v21, %v773_v20 }
 0x1f9   : > { %1428 = vmatprep.mubr.bf16.mxu0 %v783_v23 }
 0x1fa   : > { %1429 = vmatmul.mubr.bf16.gmra.mrb[28].mxu0 %v784_v22 }
 0x2b5   : > { %v1418_v27 = vpop.f32.mrb[16].mxu0 }
 0x2b6   : > { %v899_v28 = vadd.f32 %v1418_v27, %v1252_v26  ;;  %v890_v29 = vpop.f32.mrb[17].mxu0 }
 0x2b7   : > { %v891_v30 = vadd.f32 %v1252_v26, %v890_v29  ;;  %v1419_v31 = vpop.f32.mrb[18].mxu0 }
 0x2b8   : > { %v902_v32 = vadd.f32 %v1419_v31, %v1252_v26  ;;  %v893_v33 = vpop.f32.mrb[19].mxu0  ;;  %v955_v35 = vmax.f32 %v899_v28, 0.0 }
 0x2b9   : > { %v894_v34 = vadd.f32 %v1252_v26, %v893_v33  ;;  %v953_v37 = vmax.f32 %v891_v30, 0.0 }
 0x2ba   : > { %v956_v36 = vmax.f32 %v902_v32, 0.0 }
 0x2bb   : > { %v954_v38 = vmax.f32 %v894_v34, 0.0 }
 0x2bc   : > { %v970_v39 = vpack.c.bf16 %v956_v36, %v955_v35 }
 0x2bd   : > { %v969_v40 = vpack.c.bf16 %v954_v38, %v953_v37  ;;  %v1422_v41 = vpop.f32.mrb[20].mxu0 }
 0x2be   : > { %v915_v42 = vadd.f32 %v1422_v41, %v1252_v26  ;;  %v906_v43 = vpop.f32.mrb[21].mxu0 }
 0x2bf   : > { %v907_v44 = vadd.f32 %v1252_v26, %v906_v43  ;;  %v1423_v45 = vpop.f32.mrb[22].mxu0  ;;  %1448 = vmatprep.mubr.bf16.mxu1 %v969_v40 }
 0x2c0   : > { %v918_v46 = vadd.f32 %v1423_v45, %v1252_v26  ;;  %v909_v47 = vpop.f32.mrb[23].mxu0  ;;  %1449 = vmatmul.mubr.bf16.vlgmr.msra.gmra.mrb[16].mxu1 %v970_v39  ;;  %v959_v49 = vmax.f32 %v915_v42, 0.0 }
 0x2c1   : > { %v910_v48 = vadd.f32 %v1252_v26, %v909_v47  ;;  %v957_v51 = vmax.f32 %v907_v44, 0.0 }
 0x2c2   : > { %v960_v50 = vmax.f32 %v918_v46, 0.0 }
 0x2c3   : > { %v958_v52 = vmax.f32 %v910_v48, 0.0 }
 0x2c4   : > { %v972_v53 = vpack.c.bf16 %v960_v50, %v959_v49 }
 0x2c5   : > { %v971_v54 = vpack.c.bf16 %v958_v52, %v957_v51  ;;  %v1426_v55 = vpop.f32.mrb[24].mxu0 }
 0x2c6   : > { %v931_v56 = vadd.f32 %v1426_v55, %v1252_v26  ;;  %v922_v57 = vpop.f32.mrb[25].mxu0 }
 0x2c7   : > { %v923_v58 = vadd.f32 %v1252_v26, %v922_v57  ;;  %v1427_v59 = vpop.f32.mrb[26].mxu0  ;;  %1452 = vmatprep.mubr.bf16.mxu1 %v971_v54 }
 0x2c8   : > { %v934_v60 = vadd.f32 %v1427_v59, %v1252_v26  ;;  %v925_v61 = vpop.f32.mrb[27].mxu0  ;;  %1453 = vmatmul.mubr.bf16.gmra.mrb[20].mxu1 %v972_v53  ;;  %v963_v63 = vmax.f32 %v931_v56, 0.0 }
 0x2c9   : > { %v926_v62 = vadd.f32 %v1252_v26, %v925_v61  ;;  %v961_v1 = vmax.f32 %v923_v58, 0.0 }
 0x2ca   : > { %v964_v0 = vmax.f32 %v934_v60, 0.0 }
 0x2cb   : > { %v962_v2 = vmax.f32 %v926_v62, 0.0 }
 0x2cc   : > { %v974_v3 = vpack.c.bf16 %v964_v0, %v963_v63 }
 0x2cd   : > { %v973_v4 = vpack.c.bf16 %v962_v2, %v961_v1  ;;  %v1430_v5 = vpop.f32.mrb[28].mxu0 }
 0x2ce   : > { %v947_v6 = vadd.f32 %v1430_v5, %v1252_v26  ;;  %v938_v7 = vpop.f32.mrb[29].mxu0 }
 0x2cf   : > { %v939_v8 = vadd.f32 %v1252_v26, %v938_v7  ;;  %v1431_v9 = vpop.f32.mrb[30].mxu0  ;;  %1456 = vmatprep.mubr.bf16.mxu1 %v973_v4 }
 0x2d0   : > { %v950_v10 = vadd.f32 %v1431_v9, %v1252_v26  ;;  %v941_v11 = vpop.f32.mrb[31].mxu0  ;;  %1457 = vmatmul.mubr.bf16.gmra.mrb[24].mxu1 %v974_v3  ;;  %v967_v13 = vmax.f32 %v947_v6, 0.0 }
 0x2d1   : > { %v942_v12 = vadd.f32 %v1252_v26, %v941_v11  ;;  %v965_v15 = vmax.f32 %v939_v8, 0.0 }
 0x2d2   : > { %v968_v14 = vmax.f32 %v950_v10, 0.0 }
 0x2d3   : > { %v966_v16 = vmax.f32 %v942_v12, 0.0 }
 0x2d4   : > { %v976_v17 = vpack.c.bf16 %v968_v14, %v967_v13 }
 0x2d5   : > { %v975_v18 = vpack.c.bf16 %v966_v16, %v965_v15 }
 0x2d7   : > { %1460 = vmatprep.mubr.bf16.mxu1 %v975_v18 }
 0x2d8   : > { %1461 = vmatmul.mubr.bf16.gmra.mrb[28].mxu1 %v976_v17 }
 0x393   : > { %v1450_v20 = vpop.f32.mrb[16].mxu1 }
 0x394   : > { %v1091_v21 = vadd.f32 %v1450_v20, %v1261_v19  ;;  %v1082_v22 = vpop.f32.mrb[17].mxu1 }
 0x395   : > { %v1083_v23 = vadd.f32 %v1261_v19, %v1082_v22  ;;  %v1451_v24 = vpop.f32.mrb[18].mxu1 }
 0x396   : > { %1147 = vst [vmem:[%s1706_s15 + $0x10] sm:$0xff] %v1091_v21  ;;  %v1094_v25 = vadd.f32 %v1451_v24, %v1261_v19  ;;  %v1085_v26 = vpop.f32.mrb[19].mxu1 }
 0x397   : > { %1145 = vst [vmem:[%s1706_s15] sm:$0xff] %v1083_v23  ;;  %v1086_v27 = vadd.f32 %v1261_v19, %v1085_v26 }
 0x398   : > { %1148 = vst [vmem:[%s1706_s15 + $0x18] sm:$0xff] %v1094_v25 }
 0x399   : > { %1146 = vst [vmem:[%s1706_s15 + $0x8] sm:$0xff] %v1086_v27 }
 0x39b   : > { %v1454_v28 = vpop.f32.mrb[20].mxu1 }
 0x39c   : > { %v1107_v29 = vadd.f32 %v1454_v28, %v1261_v19  ;;  %v1098_v30 = vpop.f32.mrb[21].mxu1 }
 0x39d   : > { %v1099_v31 = vadd.f32 %v1261_v19, %v1098_v30  ;;  %v1455_v32 = vpop.f32.mrb[22].mxu1 }
 0x39e   : > { %1151 = vst [vmem:[%s1706_s15 + $0x30] sm:$0xff] %v1107_v29  ;;  %v1110_v33 = vadd.f32 %v1455_v32, %v1261_v19  ;;  %v1101_v34 = vpop.f32.mrb[23].mxu1 }
 0x39f   : > { %1149 = vst [vmem:[%s1706_s15 + $0x20] sm:$0xff] %v1099_v31  ;;  %v1102_v35 = vadd.f32 %v1261_v19, %v1101_v34 }
 0x3a0   : > { %1152 = vst [vmem:[%s1706_s15 + $0x38] sm:$0xff] %v1110_v33 }
 0x3a1   : > { %1150 = vst [vmem:[%s1706_s15 + $0x28] sm:$0xff] %v1102_v35 }
 0x3a3   : > { %v1458_v36 = vpop.f32.mrb[24].mxu1 }
 0x3a4   : > { %v1123_v37 = vadd.f32 %v1458_v36, %v1261_v19  ;;  %v1114_v38 = vpop.f32.mrb[25].mxu1 }
 0x3a5   : > { %v1115_v39 = vadd.f32 %v1261_v19, %v1114_v38  ;;  %v1459_v40 = vpop.f32.mrb[26].mxu1 }
 0x3a6   : > { %1155 = vst [vmem:[%s1706_s15 + $0x50] sm:$0xff] %v1123_v37  ;;  %v1126_v41 = vadd.f32 %v1459_v40, %v1261_v19  ;;  %v1117_v42 = vpop.f32.mrb[27].mxu1 }
 0x3a7   : > { %1153 = vst [vmem:[%s1706_s15 + $0x40] sm:$0xff] %v1115_v39  ;;  %v1118_v43 = vadd.f32 %v1261_v19, %v1117_v42 }
 0x3a8   : > { %1156 = vst [vmem:[%s1706_s15 + $0x58] sm:$0xff] %v1126_v41 }
 0x3a9   : > { %1154 = vst [vmem:[%s1706_s15 + $0x48] sm:$0xff] %v1118_v43 }
 0x3ab   : > { %v1462_v44 = vpop.f32.mrb[28].mxu1 }
 0x3ac   : > { %v1139_v45 = vadd.f32 %v1462_v44, %v1261_v19  ;;  %v1130_v46 = vpop.f32.mrb[29].mxu1 }
 0x3ad   : > { %v1131_v47 = vadd.f32 %v1261_v19, %v1130_v46  ;;  %v1463_v48 = vpop.f32.mrb[30].mxu1 }
 0x3ae   : > { %1159 = vst [vmem:[%s1706_s15 + $0x70] sm:$0xff] %v1139_v45  ;;  %v1142_v49 = vadd.f32 %v1463_v48, %v1261_v19  ;;  %v1133_v50 = vpop.f32.mrb[31].mxu1 }
 0x3af   : > { %1157 = vst [vmem:[%s1706_s15 + $0x60] sm:$0xff] %v1131_v47  ;;  %v1134_v51 = vadd.f32 %v1261_v19, %v1133_v50 }
 0x3b0   : > { %1160 = vst [vmem:[%s1706_s15 + $0x78] sm:$0xff] %v1142_v49 }
 0x3b1   : > { %1158 = vst [vmem:[%s1706_s15 + $0x68] sm:$0xff] %v1134_v51 }
 0x3b2 PF: > { %s19_s30 = sadd.s32 1, %s1518_s30  }
 0x3b3   : > { %p16_p4 = scmp.ge.s32.totalorder %s19_s30, 4  }
 0x3b5   :  { %18 = sbr.rel (!%p16_p4) target bundleno = 1 (0x1), region = 86 }

</bundles_post_ra>
